<compile_context>
chip_gen: v7x
topology: tpu7x:2x2x1
jax: 0.10.0
libtpu: 0.0.40
codegen_flags: <defaults>
</compile_context>

<pallas_src>
import functools
import math

import jax
import jax.numpy as jnp
from jax import lax
from jax.experimental import pallas as pl
from jax.experimental.pallas import tpu as pltpu


_VMEM_LIMIT_BYTES = 48 * 1024 * 1024  # above default scoped limits, below v7x physical


# ----------------------------------------------------------------------------
# tiling helper
# ----------------------------------------------------------------------------
def _pick_tile(dim, target, align):
    """Largest tile <= target that divides `dim` and is a multiple of `align`;
    falls back to the full dim (a full-extent block is always legal)."""
    if dim <= target:
        return dim
    t = (target // align) * align
    while t >= align:
        if dim % t == 0:
            return t
        t -= align
    return dim


# ----------------------------------------------------------------------------
# Kernel 1: fused multi-projection  x[B,S,K] @ w_i[K,N_i] -> out_i[B,S,N_i]
# One x tile read from HBM serves every weight (fused QKV / fused KV).
# Outputs stay in the fused [B, S, H*D] layout -> lane-dense stores.
# ----------------------------------------------------------------------------
def _make_proj_kernel(n_proj):
    def kernel(*refs):
        x_ref = refs[0]
        w_refs = refs[1:1 + n_proj]
        o_refs = refs[1 + n_proj:]
        x = x_ref[...]
        for w_ref, o_ref in zip(w_refs, o_refs):
            o_ref[...] = jnp.dot(
                x, w_ref[...], preferred_element_type=jnp.float32
            ).astype(o_ref.dtype)
    return kernel


def fused_projection(x, weights, *, ts_target=512):
    """x: [B, S, K]; weights: list of [K, N_i] -> list of [B, S, N_i]."""
    B, S, K = x.shape
    n = len(weights)
    ts = _pick_tile(S, ts_target, 16)          # bf16 sublane alignment
    grid = (B, S // ts)

    in_specs = [pl.BlockSpec((None, ts, K), lambda b, si: (b, si, 0))]
    out_specs = []
    out_shapes = []
    for w in weights:
        K2, N = w.shape
        assert K2 == K
        # Weight block index is constant across the grid -> DMA'd once, resident.
        # TODO(synk): for very large d_model the full [K, N] weight panel may not
        #             fit VMEM; tile the N axis in that regime.
        in_specs.append(pl.BlockSpec((K, N), lambda b, si: (0, 0)))
        out_specs.append(pl.BlockSpec((None, ts, N), lambda b, si: (b, si, 0)))
        out_shapes.append(jax.ShapeDtypeStruct((B, S, N), x.dtype))

    outs = pl.pallas_call(
        _make_proj_kernel(n),
        out_shape=tuple(out_shapes),
        grid=grid,
        in_specs=in_specs,
        out_specs=tuple(out_specs),
        compiler_params=pltpu.CompilerParams(
            dimension_semantics=("parallel", "parallel"),
            vmem_limit_bytes=_VMEM_LIMIT_BYTES),
    )(x, *weights)
    if not isinstance(outs, (list, tuple)):
        outs = (outs,)
    return list(outs)


# ----------------------------------------------------------------------------
# Kernel 2: flash attention, fused-head layout, online softmax, KV tiling
# q:[B,Sq,Hq*Dk]  k:[B,Sk,Hkv*Dk]  v:[B,Sk,Hkv*Dh]  ->  o:[B,Sq,Hq*Dh]
# All query heads handled per grid step -> each K/V tile is DMA'd exactly once
# per (b, qi) regardless of n_rep (GQA/MQA handled by the head->group map).
# (softmax scale already folded into the query-projection weights)
# ----------------------------------------------------------------------------
def _flash_kernel(q_ref, k_ref, v_ref, o_ref, m_ref, l_ref, acc_ref, *,
                  n_q_heads, n_rep, key_dim, head_dim, approx_recip):
    ki = pl.program_id(2)

    @pl.when(ki == 0)
    def _init():
        m_ref[...] = jnp.full(m_ref.shape, -jnp.inf, jnp.float32)
        l_ref[...] = jnp.zeros(l_ref.shape, jnp.float32)
        acc_ref[...] = jnp.zeros(acc_ref.shape, jnp.float32)

    # Static per-head lane slices of the fused blocks (exact lane tiles when
    # key_dim / head_dim are multiples of 128).
    for h in range(n_q_heads):
        g = h // n_rep
        q_h = q_ref[:, h * key_dim:(h + 1) * key_dim]      # (tq, Dk) bf16
        k_h = k_ref[:, g * key_dim:(g + 1) * key_dim]      # (tk, Dk) bf16
        v_h = v_ref[:, g * head_dim:(g + 1) * head_dim]    # (tk, Dh) bf16

        # scores = q @ k^T via dot_general on matching last dims (no transpose)
        s = lax.dot_general(
            q_h, k_h, (((1,), (1,)), ((), ())),
            preferred_element_type=jnp.float32)             # (tq, tk) f32

        m_prev = m_ref[:, h:h + 1]                          # (tq, 1)
        m_new = jnp.maximum(m_prev, jnp.max(s, axis=-1, keepdims=True))
        alpha = jnp.exp(m_prev - m_new)
        p = jnp.exp(s - m_new)
        l_ref[:, h:h + 1] = alpha * l_ref[:, h:h + 1] + jnp.sum(
            p, axis=-1, keepdims=True)
        acc_ref[h] = alpha * acc_ref[h] + jnp.dot(
            p.astype(v_ref.dtype), v_h, preferred_element_type=jnp.float32)
        m_ref[:, h:h + 1] = m_new

    @pl.when(ki == pl.num_programs(2) - 1)
    def _epilogue():
        for h in range(n_q_heads):
            l_h = l_ref[:, h:h + 1]
            inv_l = pl.reciprocal(l_h, approx=True) if approx_recip else 1.0 / l_h
            o_ref[:, h * head_dim:(h + 1) * head_dim] = (
                acc_ref[h] * inv_l).astype(o_ref.dtype)


def flash_attention(xq, xk, xv, *, n_q_heads, n_kv_heads, key_dim, head_dim,
                    tq_target=256, tk_target=512, approx_recip=True):
    B, Sq, _ = xq.shape
    _, Sk, _ = xk.shape
    n_rep = n_q_heads // n_kv_heads
    tq = _pick_tile(Sq, tq_target, 16)    # bf16 sublane alignment
    tk = _pick_tile(Sk, tk_target, 128)   # lane / softmax-reduction axis
    grid = (B, Sq // tq, Sk // tk)

    kernel = functools.partial(
        _flash_kernel, n_q_heads=n_q_heads, n_rep=n_rep,
        key_dim=key_dim, head_dim=head_dim, approx_recip=approx_recip)

    return pl.pallas_call(
        kernel,
        out_shape=jax.ShapeDtypeStruct((B, Sq, n_q_heads * head_dim), xq.dtype),
        grid=grid,
        in_specs=[
            pl.BlockSpec((None, tq, n_q_heads * key_dim),
                         lambda b, qi, ki: (b, qi, 0)),
            pl.BlockSpec((None, tk, n_kv_heads * key_dim),
                         lambda b, qi, ki: (b, ki, 0)),
            pl.BlockSpec((None, tk, n_kv_heads * head_dim),
                         lambda b, qi, ki: (b, ki, 0)),
        ],
        out_specs=pl.BlockSpec((None, tq, n_q_heads * head_dim),
                               lambda b, qi, ki: (b, qi, 0)),
        scratch_shapes=[
            pltpu.VMEM((tq, n_q_heads), jnp.float32),              # running max
            pltpu.VMEM((tq, n_q_heads), jnp.float32),              # running denom
            pltpu.VMEM((n_q_heads, tq, head_dim), jnp.float32),    # output accum
        ],
        compiler_params=pltpu.CompilerParams(
            dimension_semantics=("parallel", "parallel", "arbitrary"),
            vmem_limit_bytes=_VMEM_LIMIT_BYTES),
    )(xq, xk, xv)


# ----------------------------------------------------------------------------
# Kernel 3: output projection as a plain matmul (full H*Dh contraction)
# attn:[B,Sq,H*Dh]  wo:[H*Dh,N]  ->  out:[B,Sq,N]
# ----------------------------------------------------------------------------
def _out_proj_kernel(a_ref, w_ref, o_ref):
    o_ref[...] = jnp.dot(
        a_ref[...], w_ref[...], preferred_element_type=jnp.float32
    ).astype(o_ref.dtype)


def output_projection(attn, wo, *, out_dtype, ts_target=512, tn_target=512):
    B, Sq, Kc = attn.shape
    Kc2, N = wo.shape
    assert Kc == Kc2
    ts = _pick_tile(Sq, ts_target, 16)
    tn = _pick_tile(N, tn_target, 128)
    grid = (B, Sq // ts, N // tn)
    # TODO(synk): for bandwidth-poor v5e this matmul could be fused into the
    #             flash epilogue when wo fits VMEM (removes one HBM round trip).
    return pl.pallas_call(
        _out_proj_kernel,
        out_shape=jax.ShapeDtypeStruct((B, Sq, N), out_dtype),
        grid=grid,
        in_specs=[
            pl.BlockSpec((None, ts, Kc), lambda b, si, ni: (b, si, 0)),
            pl.BlockSpec((Kc, tn), lambda b, si, ni: (0, ni)),
        ],
        out_specs=pl.BlockSpec((None, ts, tn), lambda b, si, ni: (b, si, ni)),
        compiler_params=pltpu.CompilerParams(
            dimension_semantics=("parallel", "parallel", "parallel"),
            vmem_limit_bytes=_VMEM_LIMIT_BYTES),
    )(attn, wo)


# ----------------------------------------------------------------------------
# Module-equivalent wrapper
# ----------------------------------------------------------------------------
class AttentionPallas:
    def __init__(self, d_model, n_heads, dropout=0.0, key_dim=None,
                 n_kv_heads=None, add_bias_kv=False, add_bias_out=False,
                 symmetric_attn=False, total_n_heads=None, *, rng_key,
                 approx_recip=True):
        self.d_model = d_model
        self.n_heads = n_heads
        self.n_kv_heads = n_heads if n_kv_heads is None else n_kv_heads
        self.total_n_heads = n_heads if total_n_heads is None else total_n_heads
        self.head_dim = d_model // self.total_n_heads
        self.key_dim = key_dim if key_dim is not None else self.head_dim
        self.n_rep_kv = self.n_heads // self.n_kv_heads
        assert self.n_heads % self.n_kv_heads == 0
        assert self.n_rep_kv * self.n_kv_heads == self.n_heads
        assert self.total_n_heads * self.head_dim == d_model
        self.attn_scale = 1.0 / math.sqrt(self.head_dim)
        self.dropout = dropout
        self.approx_recip = approx_recip
        # TODO(synk): add_bias_kv / add_bias_out bias adds not implemented (module default is False).
        assert not add_bias_kv and not add_bias_out
        # TODO(synk): training-mode dropout (pltpu.prng_*) not wired; eval mode / p=0 is identity.

        def init_linear(key, fan_in, fan_out):
            bound = 1.0 / math.sqrt(fan_in)
            return jax.random.uniform(key, (fan_in, fan_out), jnp.float32,
                                      -bound, bound)

        k1, k2, k3, k4 = jax.random.split(rng_key, 4)
        wq = init_linear(k1, d_model, self.n_heads * self.key_dim)
        wk = wq if symmetric_attn else init_linear(
            k2, d_model, self.n_kv_heads * self.key_dim)
        wv = init_linear(k3, d_model, self.n_kv_heads * self.head_dim)
        n_out = self.n_heads * self.head_dim
        wo = init_linear(k4, n_out, n_out)

        # bf16 MXU operands, fused [in, H*D] layout (no per-head transpose);
        # fold the softmax scale into wq (exact, zero runtime cost).
        self.wq = (wq * self.attn_scale).astype(jnp.bfloat16)
        self.wk = wk.astype(jnp.bfloat16)
        self.wv = wv.astype(jnp.bfloat16)
        self.wo = wo.astype(jnp.bfloat16)

    def __call__(self, query, key, value, freqs_cos=None, freqs_sin=None,
                 attn_mask=None, is_causal=False, need_weights=False):
        # TODO(synk): RoPE, attn_mask / is_causal masking and the need_weights
        #             scores path are not implemented (defaults of the module).
        assert freqs_cos is None and freqs_sin is None
        assert attn_mask is None and not is_causal
        assert not need_weights

        qb = query.astype(jnp.bfloat16)
        kb = qb if key is query else key.astype(jnp.bfloat16)
        if value is query:
            vb = qb
        elif value is key:
            vb = kb
        else:
            vb = value.astype(jnp.bfloat16)

        # Fused projections: read each distinct input from HBM only once.
        if (kb is qb) and (vb is qb):
            xq, xk, xv = fused_projection(qb, [self.wq, self.wk, self.wv])
        elif vb is kb:
            (xq,) = fused_projection(qb, [self.wq])
            xk, xv = fused_projection(kb, [self.wk, self.wv])
        else:
            (xq,) = fused_projection(qb, [self.wq])
            (xk,) = fused_projection(kb, [self.wk])
            (xv,) = fused_projection(vb, [self.wv])

        attn = flash_attention(
            xq, xk, xv,
            n_q_heads=self.n_heads, n_kv_heads=self.n_kv_heads,
            key_dim=self.key_dim, head_dim=self.head_dim,
            approx_recip=self.approx_recip)                 # [B, Sq, Hq*Dh]

        out = output_projection(attn, self.wo, out_dtype=query.dtype)
        return out, None   # (output, scores) with need_weights=False


# ----------------------------------------------------------------------------
# Pure-JAX reference (same bf16 operand casting, f32 accumulation)
# ----------------------------------------------------------------------------
def reference(mod, query, key, value):
    f32 = jnp.float32
    qb, kb, vb = (t.astype(jnp.bfloat16) for t in (query, key, value))
    Hq, Hkv, Dk, Dh = mod.n_heads, mod.n_kv_heads, mod.key_dim, mod.head_dim
    xq = jnp.einsum("bsk,kn->bsn", qb, mod.wq,
                    preferred_element_type=f32).astype(jnp.bfloat16)
    xk = jnp.einsum("bsk,kn->bsn", kb, mod.wk,
                    preferred_element_type=f32).astype(jnp.bfloat16)
    xv = jnp.einsum("bsk,kn->bsn", vb, mod.wv,
                    preferred_element_type=f32).astype(jnp.bfloat16)
    B, Sq, _ = xq.shape
    Sk = xk.shape[1]
    xq = xq.reshape(B, Sq, Hq, Dk).transpose(0, 2, 1, 3)
    xk = xk.reshape(B, Sk, Hkv, Dk).transpose(0, 2, 1, 3)
    xv = xv.reshape(B, Sk, Hkv, Dh).transpose(0, 2, 1, 3)
    if mod.n_rep_kv != 1:
        xk = jnp.repeat(xk, mod.n_rep_kv, axis=1)
        xv = jnp.repeat(xv, mod.n_rep_kv, axis=1)
    s = jnp.einsum("bhqd,bhkd->bhqk", xq, xk, preferred_element_type=f32)
    p = jax.nn.softmax(s, axis=-1)
    o = jnp.einsum("bhqk,bhkd->bhqd", p.astype(jnp.bfloat16), xv,
                   preferred_element_type=f32).astype(jnp.bfloat16)
    o = o.transpose(0, 2, 1, 3).reshape(B, Sq, Hq * Dh)
    return jnp.einsum("bsm,mn->bsn", o, mod.wo, preferred_element_type=f32)


if __name__ == "__main__":
    root = jax.random.PRNGKey(0)
    k_par, k_x, k_par2, k_q2, k_k2, k_v2 = jax.random.split(root, 6)

    # Case 1: standard MHA self-attention (exercises the fused-QKV path).
    d_model, n_heads, seq, bsz = 32, 4, 8, 2
    mod = AttentionPallas(d_model=d_model, n_heads=n_heads, dropout=0.0,
                          rng_key=k_par)
    x = jax.random.normal(k_x, (bsz, seq, d_model), jnp.float32)
    out, scores = mod(x, x, x)
    out = jax.block_until_ready(out)
    assert out.shape == (bsz, seq, d_model), out.shape
    ref = reference(mod, x, x, x)
    err = float(jnp.max(jnp.abs(out - ref)))
    assert jnp.allclose(out, ref, atol=2e-2, rtol=2e-2), err

    # Case 2: grouped-query cross-attention (exercises the h // n_rep group map,
    #         separate projections and a key length different from query length).
    mod2 = AttentionPallas(d_model=32, n_heads=4, dropout=0.0, n_kv_heads=2,
                           rng_key=k_par2)
    q2 = jax.random.normal(k_q2, (2, 8, 32), jnp.float32)
    k2 = jax.random.normal(k_k2, (2, 16, 32), jnp.float32)
    v2 = jax.random.normal(k_v2, (2, 16, 32), jnp.float32)
    out2, _ = mod2(q2, k2, v2)
    out2 = jax.block_until_ready(out2)
    ref2 = reference(mod2, q2, k2, v2)
    err2 = float(jnp.max(jnp.abs(out2 - ref2)))
    assert out2.shape == (2, 8, 32), out2.shape
    assert jnp.allclose(out2, ref2, atol=2e-2, rtol=2e-2), err2

    print("KERNEL_OK")
</pallas_src>

<mosaic_0001>
module attributes {stable_mosaic.version = 11 : i64} {
  func.func @kernel(%arg0: i32, %arg1: i32, %arg2: memref<1x8x32xbf16, #tpu.memory_space<vmem>>, %arg3: memref<32x32xbf16, #tpu.memory_space<vmem>>, %arg4: memref<32x32xbf16, #tpu.memory_space<vmem>>, %arg5: memref<32x32xbf16, #tpu.memory_space<vmem>>, %arg6: memref<1x8x32xbf16, #tpu.memory_space<vmem>>, %arg7: memref<1x8x32xbf16, #tpu.memory_space<vmem>>, %arg8: memref<1x8x32xbf16, #tpu.memory_space<vmem>>) attributes {dimension_semantics = [#tpu.dimension_semantics<parallel>, #tpu.dimension_semantics<parallel>], iteration_bounds = array<i64: 2, 1>, scalar_prefetch = 0 : i64, scratch_operands = 0 : i64, tpu.core_type = #tpu.core_type<tc>, window_params = [{transform_indices = @transform_0, window_bounds = array<i64: 1, 8, 32>}, {pipeline_mode = #tpu.pipeline_mode<synchronous>, transform_indices = @transform_1, window_bounds = array<i64: 32, 32>}, {pipeline_mode = #tpu.pipeline_mode<synchronous>, transform_indices = @transform_2, window_bounds = array<i64: 32, 32>}, {pipeline_mode = #tpu.pipeline_mode<synchronous>, transform_indices = @transform_3, window_bounds = array<i64: 32, 32>}, {transform_indices = @transform_4, window_bounds = array<i64: 1, 8, 32>}, {transform_indices = @transform_5, window_bounds = array<i64: 1, 8, 32>}, {transform_indices = @transform_6, window_bounds = array<i64: 1, 8, 32>}]} {
    %c0 = arith.constant 0 : index
    %c0_0 = arith.constant 0 : index
    %c0_1 = arith.constant 0 : index
    %0 = vector.load %arg2[%c0, %c0_0, %c0_1] : memref<1x8x32xbf16, #tpu.memory_space<vmem>>, vector<1x8x32xbf16>
    %1 = vector.shape_cast %0 : vector<1x8x32xbf16> to vector<8x32xbf16>
    %c0_2 = arith.constant 0 : index
    %c0_3 = arith.constant 0 : index
    %2 = vector.load %arg3[%c0_2, %c0_3] : memref<32x32xbf16, #tpu.memory_space<vmem>>, vector<32x32xbf16>
    %cst = arith.constant dense<0.000000e+00> : vector<8x32xf32>
    %3 = tpu.matmul %1, %2, %cst {dimension_numbers = #tpu.dot_dimension_numbers<[1], [0], [0], [1], [0, 0, 1, 1], [], []>} : vector<8x32xbf16>, vector<32x32xbf16>, vector<8x32xf32> -> vector<8x32xf32>
    %4 = arith.truncf %3 : vector<8x32xf32> to vector<8x32xbf16>
    %c0_4 = arith.constant 0 : index
    %c0_5 = arith.constant 0 : index
    %c0_6 = arith.constant 0 : index
    %5 = vector.load %arg6[%c0_4, %c0_5, %c0_6] : memref<1x8x32xbf16, #tpu.memory_space<vmem>>, vector<1x8x32xbf16>
    %6 = vector.shape_cast %5 : vector<1x8x32xbf16> to vector<8x32xbf16>
    %7 = vector.shape_cast %4 : vector<8x32xbf16> to vector<1x8x32xbf16>
    tpu.vector_store %arg6[%c0_4, %c0_5, %c0_6], %7 {strides = array<i32>} : memref<1x8x32xbf16, #tpu.memory_space<vmem>>, vector<1x8x32xbf16>,
    %c0_7 = arith.constant 0 : index
    %c0_8 = arith.constant 0 : index
    %8 = vector.load %arg4[%c0_7, %c0_8] : memref<32x32xbf16, #tpu.memory_space<vmem>>, vector<32x32xbf16>
    %cst_9 = arith.constant dense<0.000000e+00> : vector<8x32xf32>
    %9 = tpu.matmul %1, %8, %cst_9 {dimension_numbers = #tpu.dot_dimension_numbers<[1], [0], [0], [1], [0, 0, 1, 1], [], []>} : vector<8x32xbf16>, vector<32x32xbf16>, vector<8x32xf32> -> vector<8x32xf32>
    %10 = arith.truncf %9 : vector<8x32xf32> to vector<8x32xbf16>
    %c0_10 = arith.constant 0 : index
    %c0_11 = arith.constant 0 : index
    %c0_12 = arith.constant 0 : index
    %11 = vector.load %arg7[%c0_10, %c0_11, %c0_12] : memref<1x8x32xbf16, #tpu.memory_space<vmem>>, vector<1x8x32xbf16>
    %12 = vector.shape_cast %11 : vector<1x8x32xbf16> to vector<8x32xbf16>
    %13 = vector.shape_cast %10 : vector<8x32xbf16> to vector<1x8x32xbf16>
    tpu.vector_store %arg7[%c0_10, %c0_11, %c0_12], %13 {strides = array<i32>} : memref<1x8x32xbf16, #tpu.memory_space<vmem>>, vector<1x8x32xbf16>,
    %c0_13 = arith.constant 0 : index
    %c0_14 = arith.constant 0 : index
    %14 = vector.load %arg5[%c0_13, %c0_14] : memref<32x32xbf16, #tpu.memory_space<vmem>>, vector<32x32xbf16>
    %cst_15 = arith.constant dense<0.000000e+00> : vector<8x32xf32>
    %15 = tpu.matmul %1, %14, %cst_15 {dimension_numbers = #tpu.dot_dimension_numbers<[1], [0], [0], [1], [0, 0, 1, 1], [], []>} : vector<8x32xbf16>, vector<32x32xbf16>, vector<8x32xf32> -> vector<8x32xf32>
    %16 = arith.truncf %15 : vector<8x32xf32> to vector<8x32xbf16>
    %c0_16 = arith.constant 0 : index
    %c0_17 = arith.constant 0 : index
    %c0_18 = arith.constant 0 : index
    %17 = vector.load %arg8[%c0_16, %c0_17, %c0_18] : memref<1x8x32xbf16, #tpu.memory_space<vmem>>, vector<1x8x32xbf16>
    %18 = vector.shape_cast %17 : vector<1x8x32xbf16> to vector<8x32xbf16>
    %19 = vector.shape_cast %16 : vector<8x32xbf16> to vector<1x8x32xbf16>
    tpu.vector_store %arg8[%c0_16, %c0_17, %c0_18], %19 {strides = array<i32>} : memref<1x8x32xbf16, #tpu.memory_space<vmem>>, vector<1x8x32xbf16>,
    return
  }
  func.func @transform_0(%arg0: i32, %arg1: i32) -> (i32, i32, i32) {
    %c0_i32 = arith.constant 0 : i32
    %c0_i32_0 = arith.constant 0 : i32
    return %arg0, %arg1, %c0_i32 : i32, i32, i32
  }
  func.func @transform_1(%arg0: i32, %arg1: i32) -> (i32, i32) {
    %c0_i32 = arith.constant 0 : i32
    %c0_i32_0 = arith.constant 0 : i32
    %c0_i32_1 = arith.constant 0 : i32
    return %c0_i32, %c0_i32_0 : i32, i32
  }
  func.func @transform_2(%arg0: i32, %arg1: i32) -> (i32, i32) {
    %c0_i32 = arith.constant 0 : i32
    %c0_i32_0 = arith.constant 0 : i32
    %c0_i32_1 = arith.constant 0 : i32
    return %c0_i32, %c0_i32_0 : i32, i32
  }
  func.func @transform_3(%arg0: i32, %arg1: i32) -> (i32, i32) {
    %c0_i32 = arith.constant 0 : i32
    %c0_i32_0 = arith.constant 0 : i32
    %c0_i32_1 = arith.constant 0 : i32
    return %c0_i32, %c0_i32_0 : i32, i32
  }
  func.func @transform_4(%arg0: i32, %arg1: i32) -> (i32, i32, i32) {
    %c0_i32 = arith.constant 0 : i32
    %c0_i32_0 = arith.constant 0 : i32
    return %arg0, %arg1, %c0_i32 : i32, i32, i32
  }
  func.func @transform_5(%arg0: i32, %arg1: i32) -> (i32, i32, i32) {
    %c0_i32 = arith.constant 0 : i32
    %c0_i32_0 = arith.constant 0 : i32
    return %arg0, %arg1, %c0_i32 : i32, i32, i32
  }
  func.func @transform_6(%arg0: i32, %arg1: i32) -> (i32, i32, i32) {
    %c0_i32 = arith.constant 0 : i32
    %c0_i32_0 = arith.constant 0 : i32
    return %arg0, %arg1, %c0_i32 : i32, i32, i32
  }
}

</mosaic_0001>

<bundles_post_ra>
// kernel: tpu_custom_call.1
= control target key start
LH: loop header
LB: loop body
LE: loop exit
PB: predicated region body
PF: predicated region fallthrough
CT: control target
= control target key end

     0   :  { %12 = vsyncpa [#allocation3], 0  ;;  %s1623_s0 = inlined_call_operand.hbm [shape: bf16[2,8,32], index: 0, kind: input, shape index: {}]   ;;  %s1624_s1 = inlined_call_operand.hbm [shape: bf16[32,32], index: 1, kind: input, shape index: {}]   ;;  %s1625_s2 = inlined_call_operand.hbm [shape: bf16[32,32], index: 2, kind: input, shape index: {}]   ;;  %s1626_s3 = inlined_call_operand.hbm [shape: bf16[32,32], index: 3, kind: input, shape index: {}]   ;;  %s1627_s4 = inlined_call_operand.hbm [shape: bf16[2,8,32], index: 4, kind: output, shape index: {0}]   ;;  %s1628_s5 = inlined_call_operand.hbm [shape: bf16[2,8,32], index: 5, kind: output, shape index: {1}]   ;;  %s1629_s6 = inlined_call_operand.hbm [shape: bf16[2,8,32], index: 6, kind: output, shape index: {2}]  }
   0x1   :  { %14 = vsyncpa [#allocation3 + $0x1], 0 }
   0x2   :  { %15 = vsyncpa [#allocation6], 0 }
   0x3   :  { %16 = vsyncpa [#allocation9], 0 }
   0x4   :  { %17 = vsyncpa [#allocation4], 0 }
   0x5   :  { %19 = vsyncpa [#allocation4 + $0x1], 0 }
   0x6   :  { %20 = vsyncpa [#allocation12], 0 }
   0x7   :  { %22 = vsyncpa [#allocation12 + $0x1], 0  ;;  %s1248_s21 = smov 0   ;;  %s1250_s22 = smov 0  }
   0x8   :  { %s1252_s23 = smov 0   ;;  %s1254_s24 = smov 0  }
   0x9   :  { %s1256_s25 = smov 0   ;;  %s1258_s26 = smov 0  }
   0xa LB: > { %1636 = sst [smem:[#allocation19_spill]] %s1180_s21  ;;  %s1279_s27 = sadd.s32 4294967295, %s1200_s26   ;;  %s1200_s26 = sphi %s1258_s26, %s28_s26   ;;  %s1196_s25 = sphi %s1256_s25, %s1662_s25   ;;  %s1192_s24 = sphi %s1254_s24, %s1661_s24   ;;  %s1188_s23 = sphi %s1252_s23, %s1660_s23   ;;  %s1184_s22 = sphi %s1250_s22, %s1659_s22   ;;  %s1180_s21 = sphi %s1248_s21, %s1658_s21  }
   0xb   : > { %s1631_s28 = sadd.s32 4294967294, %s1200_s26   ;;  %p62_p0 = scmp.ne.s32.totalorder %s1184_s22, %s1180_s21 }
   0xc   : > { %p1630_p1 = scmp.eq.s32.totalorder %s1279_s27, 0  ;;  %p157_p3 = scmp.eq.s32.totalorder %s1631_s28, 1 }
   0xd   : > { %p758_p5 = scmp.ge.s32.totalorder %s1200_s26, 1  ;;  %p220_p7 = scmp.lt.s32.totalorder %s1200_s26, 3 }
   0xe   : > { %p1290_p4 = por %p1630_p1, %p62_p0  ;;  %p1295_p6 = por %p157_p3, %p62_p0 }
   0xf   : > { %p1300_p8 = pnand %p758_p5, %p220_p7  ;;  %s1202_s8 = smov [#allocation5]  }
  0x10   : > { %s1637_s29 = scalar_select %p1290_p4, 1, 0 }
  0x11   : > { %s1638_s30 = scalar_select %p1295_p6, 1, 0 }
  0x12   : > { %s1640_s7 = scalar_select %p1300_p8, 1, 0 }
  0x13   : > { %1639 = sst [smem:[#allocation20_spill]] %s1638_s30  ;;  %s232_s9 = sshll.u32 %s1202_s8, 4  ;;  %s1304_s9 = int_to_ptr.vmem [resolvable:$true] %s232_s9 }
  0x14   : > { %p843_p9 = pneg %p1300_p8  ;;  %s1203_s11 = smov [#allocation7]  }
  0x15   : > { %s245_s12 = sshll.u32 %s1203_s11, 4  ;;  %s1204_s13 = smov [#allocation8]   ;;  %s1315_s12 = int_to_ptr.vmem [resolvable:$true] %s245_s12 }
  0x16   : > { %p1311_p11 = pnand %p843_p9, %p1630_p1  ;;  %s1317_s14 = sshll.u32 %s1204_s13, 4  ;;  %s259_s14 = int_to_ptr.vmem [resolvable:$true] %s1317_s14 }
  0x17   : > { %s936_s17 = scalar_lea.hbm %s1624_s1, 256 }
  0x18   : > { %p937_p12 = scmp.ne.s32.totalorder %s1624_s1, %s936_s17  ;;  %p1327_p13 = pneg %p1311_p11 }
  0x19   : > { %p943_p5 = scmp.lt.u32.totalorder %s936_s17, %s1624_s1 }
  0x1a   : > { %p939_p0 = pnand %p1327_p13, %p937_p12 }
  0x1c   : > { %p940_p3 = pneg %p939_p0 }
  0x1e   : > { %p945_p7 = pnand %p943_p5, %p940_p3 }
  0x20   : > { %948 = shalt.err (!%p945_p7)
}
  0x21   : > { %s949_s13 = scalar_lea.vmem %s1304_s9, 256  ;;  %p957_p2 = scmp.lt.s32.totalorder %s1304_s9, %s1304_s9 }
  0x22   : > { %p950_p9 = scmp.ne.s32.totalorder %s1304_s9, %s949_s13  ;;  %p958_p6 = scmp.lt.s32.totalorder %s949_s13, %s949_s13 }
  0x24   : > { %p952_p10 = pnand %p950_p9, %p1327_p13  ;;  %p959_p12 = por %p958_p6, %p957_p2 }
  0x26   : > { %p953_p1 = pneg %p952_p10 }
  0x28   : > { %p960_p0 = pnand %p959_p12, %p953_p1 }
  0x2a   : > { %963 = shalt.err (!%p960_p0)
}
  0x2b   : > { %s1205_s15 = smov 64   ;;  %s1206_s16 = smov 4  }
  0x2c   : > { %846 = dma.hbm_to_vmem [thread:$0]  (!%p1311_p11), %s1624_s1, 256, %s1304_s9, [#allocation6], %s1205_s15, %s1205_s15, %s1206_s16  }
  0x2d   : > { %s964_s11 = scalar_lea.hbm %s1625_s2, 256 }
  0x2e   : > { %p965_p1 = scmp.ne.s32.totalorder %s1625_s2, %s964_s11  ;;  %p971_p10 = scmp.lt.u32.totalorder %s964_s11, %s1625_s2 }
  0x30   : > { %p967_p2 = pnand %p965_p1, %p1327_p13 }
  0x32   : > { %p968_p6 = pneg %p967_p2 }
  0x34   : > { %p973_p3 = pnand %p971_p10, %p968_p6 }
  0x36   : > { %976 = shalt.err (!%p973_p3)
}
  0x37   : > { %s977_s9 = scalar_lea.vmem %s1315_s12, 256  ;;  %p985_p12 = scmp.lt.s32.totalorder %s1315_s12, %s1315_s12 }
  0x38   : > { %p978_p5 = scmp.ne.s32.totalorder %s1315_s12, %s977_s9  ;;  %p986_p0 = scmp.lt.s32.totalorder %s977_s9, %s977_s9 }
  0x3a   : > { %p980_p7 = pnand %p978_p5, %p1327_p13  ;;  %p987_p1 = por %p986_p0, %p985_p12 }
  0x3c   : > { %p981_p9 = pneg %p980_p7 }
  0x3e   : > { %p988_p2 = pnand %p987_p1, %p981_p9 }
  0x40   : > { %991 = shalt.err (!%p988_p2)
}
  0x41   : > { %849 = dma.hbm_to_vmem [thread:$0]  (!%p1311_p11), %s1625_s2, 256, %s1315_s12, [#allocation6], %s1205_s15, %s1205_s15, %s1206_s16  }
  0x42   : > { %s992_s18 = scalar_lea.hbm %s1626_s3, 256 }
  0x43   : > { %p993_p6 = scmp.ne.s32.totalorder %s1626_s3, %s992_s18  ;;  %p999_p5 = scmp.lt.u32.totalorder %s992_s18, %s1626_s3 }
  0x45   : > { %p995_p10 = pnand %p993_p6, %p1327_p13 }
  0x47   : > { %p996_p3 = pneg %p995_p10 }
  0x49   : > { %p1001_p7 = pnand %p999_p5, %p996_p3 }
  0x4b   : > { %1004 = shalt.err (!%p1001_p7)
}
  0x4c   : > { %s1005_s9 = scalar_lea.vmem %s259_s14, 256  ;;  %p1013_p1 = scmp.lt.s32.totalorder %s259_s14, %s259_s14 }
  0x4d   : > { %p1006_p9 = scmp.ne.s32.totalorder %s259_s14, %s1005_s9  ;;  %p1014_p2 = scmp.lt.s32.totalorder %s1005_s9, %s1005_s9 }
  0x4f   : > { %p1008_p12 = pnand %p1006_p9, %p1327_p13  ;;  %p1015_p4 = por %p1014_p2, %p1013_p1 }
  0x51   : > { %p1009_p0 = pneg %p1008_p12 }
  0x53   : > { %p1016_p8 = pnand %p1015_p4, %p1009_p0 }
  0x55   : > { %1019 = shalt.err (!%p1016_p8)
}
  0x56   : > { %852 = dma.hbm_to_vmem [thread:$0]  (!%p1311_p11), %s1626_s3, 256, %s259_s14, [#allocation9], %s1205_s15, %s1205_s15, %s1206_s16  }
  0x57   : > { %s49_s20 = sadd.s32 1, %s1188_s23  ;;  %s40_s10 = sadd.s32 1, %s1196_s25 }
  0x58   : > { %p56_p4 = scmp.ne.s32.totalorder %s1188_s23, %s1184_s22  ;;  %p42_p8 = scmp.ge.s32.totalorder %s40_s10, 2 }
  0x59   : > { %p57_p13 = scmp.eq.s32.totalorder %s1200_s26, 0  ;;  %p1643_p6 = scmp.eq.s32.totalorder %s1279_s27, 1 }
  0x5a   : > { %p870_p3 = scmp.lt.s32.totalorder %s1200_s26, 2  ;;  %s1664_s10 = smov (%p42_p8, %s40_s10), 0 }
  0x5b   : > { %p1406_p10 = por %p1643_p6, %p56_p4  ;;  %p58_p5 = por %p57_p13, %p56_p4 }
  0x5c   : > { %s272_s30 = sand.u32 1, %s1188_s23   ;;  %s44_s17 = ssub.s32 %s1196_s25, %s1664_s10 }
  0x5d   : > { %p47_p7 = scmp.eq.s32.totalorder %s44_s17, 0  ;;  %s763_s14 = sshll.u32 %s272_s30, 2 }
  0x5e   : > { %s764_s15 = sshll.u32 %s1196_s25, 6  ;;  %s276_s11 = scalar_lea.vmem [#allocation2], %s763_s14 }
  0x5f   : > { %s1418_s16 = scalar_select %p47_p7, %s1188_s23, %s49_s20  }
  0x60   : > { %s1423_s8 = scalar_lea.hbm %s1623_s0, %s764_s15  ;;  %s284_s13 = sshll.u32 %s276_s11, 4  ;;  %s1425_s13 = int_to_ptr.vmem [resolvable:$true] %s284_s13 }
  0x61   : > { %p1429_p11 = pnand %p870_p3, %p58_p5  ;;  %s273_s12 = scalar_lea.sflag [#allocation3], %s272_s30 }
  0x62   : > { %s1020_s21 = scalar_lea.hbm %s1423_s8, 64  ;;  %s1025_s14 = scalar_lea.hbm %s1623_s0, 128 }
  0x63   : > { %p1021_p9 = scmp.ne.s32.totalorder %s1423_s8, %s1020_s21  ;;  %p1022_p12 = pneg %p1429_p11 }
  0x64   : > { %p1026_p2 = scmp.lt.u32.totalorder %s1423_s8, %s1623_s0  ;;  %p1027_p4 = scmp.lt.u32.totalorder %s1025_s14, %s1020_s21 }
  0x65   : > { %p1023_p0 = pnand %p1022_p12, %p1021_p9  ;;  %p1029_p13 = scmp.lt.u32.totalorder %s1020_s21, %s1423_s8 }
  0x66   : > { %p1028_p8 = por %p1027_p4, %p1026_p2 }
  0x67   : > { %p1024_p1 = pneg %p1023_p0 }
  0x68   : > { %p1030_p6 = por %p1029_p13, %p1028_p8 }
  0x6a   : > { %p1031_p3 = pnand %p1030_p6, %p1024_p1 }
  0x6c   : > { %1034 = shalt.err (!%p1031_p3)
}
  0x6d   : > { %s1035_s30 = scalar_lea.vmem %s1425_s13, 64  ;;  %s1207_s19 = smov [#allocation2]  }
  0x6e   : > { %p1036_p5 = scmp.ne.s32.totalorder %s1425_s13, %s1035_s30  ;;  %s1040_s11 = sshll.u32 %s1207_s19, 4  ;;  %s1041_s11 = int_to_ptr.vmem [resolvable:$false] %s1040_s11 }
  0x6f   : > { %s1042_s20 = scalar_lea.vmem %s1041_s11, 128  ;;  %p1043_p0 = scmp.lt.s32.totalorder %s1425_s13, %s1041_s11 }
  0x70   : > { %p1038_p7 = pnand %p1036_p5, %p1022_p12  ;;  %p1044_p2 = scmp.lt.s32.totalorder %s1042_s20, %s1035_s30 }
  0x72   : > { %p1039_p9 = pneg %p1038_p7  ;;  %p1045_p4 = por %p1044_p2, %p1043_p0 }
  0x74   : > { %p1046_p8 = pnand %p1045_p4, %p1039_p9 }
  0x76   : > { %1049 = shalt.err (!%p1046_p8)
}
  0x77   : > { %856 = dma.hbm_to_vmem [thread:$0]  (!%p1429_p11), %s1423_s8, 64, %s1425_s13, %s273_s12  }
  0x78   : > { %p1646_p1 = scmp.ne.s32.totalorder %s1640_s7, 0 }
  0x79   : > { %s1461_s21 = sand.u32 (!%p1646_p1), 1, %s1184_s22   ;;  %p1647_p12 = scmp.ne.s32.totalorder (!%p1646_p1), %s1637_s29, 0 }
  0x7a   : > { %293 = sbr.rel (%p1646_p1) target bundleno = 421 (0x1a5), region = 36  ;;  %s1464_s17 = sshll.u32 (!%p1646_p1), %s1461_s21, 2 }
  0x7b   : > { %s296_s14 = scalar_lea.sflag (!%p1646_p1), [#allocation3], %s1461_s21  ;;  %s299_s15 = scalar_lea.vmem (!%p1646_p1), [#allocation2], %s1464_s17 }
  0x81   : > { %1159 = dma.done.wait (%p1647_p12), %s296_s14, 64  }
  0x82   : > { %1161 = vsyncadd (%p1647_p12), %s296_s14, 4294967232  ;;  %p1648_p11 = scmp.eq.s32.totalorder %s1279_s27, 0 }
  0x84   : > { %1163 = dma.done.wait (%p1648_p11), [#allocation6], 512   ;;  %p1649_p13 = pmov %p1648_p11 }
  0x85   : > { %p1650_p6 = pmov %p1648_p11 }
  0x86   : > { %1165 = vsyncadd (%p1649_p13), [#allocation6], 4294966784 }
  0x87   : > { %1167 = dma.done.wait (%p1650_p6), [#allocation9], 256   ;;  %p1651_p3 = pmov %p1650_p6 }
  0x88   : > { %v1208_v0 = vmov 0.0   ;;  %vm1209_vm0 = vmmov 0   ;;  %v930_v1 = vld [vmem:[#allocation5] sm:$0xff]   ;;  %v931_v2 = vld [vmem:[#allocation5 + $0x8] sm:$0xff]   ;;  %v932_v3 = vld [vmem:[#allocation7] sm:$0xff]   ;;  %vm368_vm1 = vcmask 261120  }
  0x89   : > { %1169 = vsyncadd (%p1651_p3), [#allocation9], 4294967040  ;;  %799 = vmatprep.subr.bf16.mxu0 %v1208_v0  ;;  %807 = vmatprep.subr.bf16.mxu1 %v1208_v0  ;;  %v934_v4 = vld [vmem:[#allocation7 + $0x8] sm:$0xff]   ;;  %v933_v6 = vld [vmem:[#allocation8] sm:$0xff]   ;;  %s1484_s29 = sshll.u32 %s1192_s24, 6  ;;  %s335_s7 = scalar_lea.vmem [#allocation10], %s1464_s17 }
  0x8a   : > { %803 = vmatprep.mubr.msk.bf16.mxu0 %vm1209_vm0, %v1208_v0  ;;  %811 = vmatprep.mubr.msk.bf16.mxu1 %vm1209_vm0, %v1208_v0  ;;  %v351_v5 = vld [vmem:[%s299_s15] sm:$0xf]  ;;  %v935_v7 = vld [vmem:[#allocation8 + $0x8] sm:$0xff]   ;;  %s556_s8 = sshll.u32 %s335_s7, 4  ;;  %vm413_vm2 = vcmask 257024   ;;  %s342_s9 = scalar_lea.vmem [#allocation11], %s1464_s17  ;;  %s1497_s8 = int_to_ptr.vmem [resolvable:$true] %s556_s8 }
  0x8b   : > { %800 = vmatpush3.bf16.msra.mxu0 %v930_v1  ;;  %808 = vmatpush3.bf16.msra.mxu1 %v932_v3  ;;  %s570_s12 = sshll.u32 %s342_s9, 4  ;;  %s1495_s19 = scalar_lea.hbm %s1627_s4, %s1484_s29  ;;  %s1505_s12 = int_to_ptr.vmem [resolvable:$true] %s570_s12 }
  0x8c   : > { %801 = vmatprep.subr.bf16.mxu0 %v1208_v0  ;;  %809 = vmatprep.subr.bf16.mxu1 %v1208_v0  ;;  %s1503_s20 = scalar_lea.hbm %s1628_s5, %s1484_s29  ;;  %s532_s14 = scalar_lea.sflag [#allocation4], %s1461_s21 }
  0x8d   : > { %s1050_s15 = scalar_lea.vmem %s1497_s8, 64  ;;  %s1210_s18 = smov [#allocation10]  }
  0x8e   : > { %p1051_p5 = scmp.ne.s32.totalorder %s1497_s8, %s1050_s15  ;;  %s1054_s30 = sshll.u32 %s1210_s18, 4  ;;  %s1055_s30 = int_to_ptr.vmem [resolvable:$false] %s1054_s30 }
  0x8f   : > { %802 = vmatpush3.bf16.msra.mxu0 %v931_v2  ;;  %810 = vmatpush3.bf16.msra.mxu1 %v934_v4  ;;  %s1056_s13 = scalar_lea.vmem %s1055_s30, 128  ;;  %p1057_p0 = scmp.lt.s32.totalorder %s1497_s8, %s1055_s30 }
  0x90   : > { %815 = vmatprep.subr.bf16.mxu0 %v1208_v0  ;;  %p1052_p7 = pnand %p1051_p5, %p1406_p10  ;;  %p1058_p2 = scmp.lt.s32.totalorder %s1056_s13, %s1050_s15 }
  0x92   : > { %804 = vmatmul.mubr.msk.bf16.vlgmr.msra.gmra.mrb[0].mxu0 %vm368_vm1, %v351_v5  ;;  %812 = vmatmul.mubr.msk.bf16.vlgmr.msra.gmra.mrb[0].mxu1 %vm368_vm1, %v351_v5  ;;  %p1053_p9 = pneg %p1052_p7  ;;  %p1059_p4 = por %p1058_p2, %p1057_p0 }
  0x93   : > { %816 = vmatpush3.bf16.msra.mxu0 %v933_v6  ;;  %819 = vmatprep.mubr.msk.bf16.mxu0 %vm1209_vm0, %v1208_v0 }
  0x94   : > { %817 = vmatprep.subr.bf16.mxu0 %v1208_v0  ;;  %p1060_p8 = pnand %p1059_p4, %p1053_p9 }
  0x97   : > { %818 = vmatpush3.bf16.msra.mxu0 %v935_v7 }
  0x9a   : > { %820 = vmatmul.mubr.msk.bf16.vlgmr.msra.gmra.mrb[4].mxu0 %vm368_vm1, %v351_v5 }
 0x165   : > { %v406_v8 = vpop.f32.mrb[0].mxu0  ;;  %v465_v12 = vpop.f32.mrb[0].mxu1 }
 0x166   : > { %v412_v9 = vpack.c.bf16 %v406_v8, %v406_v8  ;;  %v805_v10 = vpop.f32.mrb[1].mxu0  ;;  %v471_v14 = vpack.c.bf16 %v465_v12, %v465_v12  ;;  %v813_v15 = vpop.f32.mrb[1].mxu1 }
 0x167   : > { %v409_v11 = vpop.f32.mrb[2].mxu0  ;;  %v468_v16 = vpop.f32.mrb[2].mxu1 }
 0x168   : > { %v806_v13 = vpop.f32.mrb[3].mxu0  ;;  %414 = vst.msk [vmem:[%s335_s7] sm:$0xf] %vm413_vm2, %v412_v9 }
 0x169   : > { %1063 = shalt.err (!%p1060_p8)
}
 0x16a   : > { %s1064_s21 = scalar_lea.hbm %s1495_s19, 64  ;;  %s1068_s11 = scalar_lea.hbm %s1627_s4, 128 }
 0x16b   : > { %p1065_p1 = scmp.ne.s32.totalorder %s1495_s19, %s1064_s21  ;;  %p1069_p13 = scmp.lt.u32.totalorder %s1495_s19, %s1627_s4 }
 0x16c   : > { %p1070_p6 = scmp.lt.u32.totalorder %s1068_s11, %s1064_s21  ;;  %p1072_p5 = scmp.lt.u32.totalorder %s1064_s21, %s1495_s19 }
 0x16d   : > { %p1066_p12 = pnand %p1065_p1, %p1406_p10 }
 0x16e   : > { %p1071_p3 = por %p1070_p6, %p1069_p13 }
 0x16f   : > { %p1067_p11 = pneg %p1066_p12 }
 0x170   : > { %p1073_p7 = por %p1072_p5, %p1071_p3 }
 0x172   : > { %p1074_p9 = pnand %p1073_p7, %p1067_p11 }
 0x174   : > { %1077 = shalt.err (!%p1074_p9)
}
 0x175   : > { %837 = dma.vmem_to_hbm [thread:$0]  (%p1406_p10), %s1497_s8, 64, %s1495_s19, %s532_s14   ;;  %v814_v17 = vpop.f32.mrb[3].mxu1  ;;  %472 = vst.msk [vmem:[%s342_s9] sm:$0xf] %vm413_vm2, %v471_v14 }
 0x176   : > { %s349_s13 = scalar_lea.vmem [#allocation13], %s1464_s17  ;;  %s1652_s21 = sand.u32 1, %s1279_s27  }
 0x177   : > { %s1536_s15 = sshll.u32 %s349_s13, 4  ;;  %s1540_s7 = scalar_lea.sflag [#allocation12], %s1652_s21  ;;  %s1571_s15 = int_to_ptr.vmem [resolvable:$true] %s1536_s15 }
 0x178   : > { %s1078_s24 = scalar_lea.vmem %s1505_s12, 64  ;;  %s1211_s11 = smov [#allocation11]  }
 0x179   : > { %p1079_p0 = scmp.ne.s32.totalorder %s1505_s12, %s1078_s24  ;;  %s1082_s18 = sshll.u32 %s1211_s11, 4  ;;  %s1083_s18 = int_to_ptr.vmem [resolvable:$false] %s1082_s18 }
 0x17a   : > { %s1084_s8 = scalar_lea.vmem %s1083_s18, 128  ;;  %p1085_p8 = scmp.lt.s32.totalorder %s1505_s12, %s1083_s18 }
 0x17b   : > { %p1080_p2 = pnand %p1079_p0, %p1406_p10  ;;  %p1086_p1 = scmp.lt.s32.totalorder %s1084_s8, %s1078_s24 }
 0x17d   : > { %p1081_p4 = pneg %p1080_p2  ;;  %p1087_p12 = por %p1086_p1, %p1085_p8 }
 0x17f   : > { %p1088_p11 = pnand %p1087_p12, %p1081_p4 }
 0x181   : > { %1091 = shalt.err (!%p1088_p11)
}
 0x182   : > { %s1092_s27 = scalar_lea.hbm %s1503_s20, 64  ;;  %s1096_s14 = scalar_lea.hbm %s1628_s5, 128 }
 0x183   : > { %p1093_p13 = scmp.ne.s32.totalorder %s1503_s20, %s1092_s27  ;;  %p1097_p5 = scmp.lt.u32.totalorder %s1503_s20, %s1628_s5 }
 0x184   : > { %p1098_p7 = scmp.lt.u32.totalorder %s1096_s14, %s1092_s27  ;;  %p1100_p0 = scmp.lt.u32.totalorder %s1092_s27, %s1503_s20 }
 0x185   : > { %p1094_p6 = pnand %p1093_p13, %p1406_p10 }
 0x186   : > { %p1099_p9 = por %p1098_p7, %p1097_p5 }
 0x187   : > { %p1095_p3 = pneg %p1094_p6 }
 0x188   : > { %p1101_p2 = por %p1100_p0, %p1099_p9 }
 0x18a   : > { %p1102_p4 = pnand %p1101_p2, %p1095_p3 }
 0x18c   : > { %1105 = shalt.err (!%p1102_p4)
}
 0x18d   : > { %838 = dma.vmem_to_hbm [thread:$0]  (%p1406_p10), %s1505_s12, 64, %s1503_s20, %s1540_s7   ;;  %v523_v18 = vpop.f32.mrb[4].mxu0 }
 0x18e   : > { %v529_v19 = vpack.c.bf16 %v523_v18, %v523_v18  ;;  %v821_v20 = vpop.f32.mrb[5].mxu0  ;;  %s1568_s18 = scalar_lea.hbm %s1629_s6, %s1484_s29  ;;  %s1106_s8 = scalar_lea.vmem %s1571_s15, 64 }
 0x18f   : > { %v526_v21 = vpop.f32.mrb[6].mxu0  ;;  %p1107_p8 = scmp.ne.s32.totalorder %s1571_s15, %s1106_s8  ;;  %s1212_s12 = smov [#allocation13]  }
 0x190   : > { %v822_v22 = vpop.f32.mrb[7].mxu0  ;;  %530 = vst.msk [vmem:[%s349_s13] sm:$0xf] %vm413_vm2, %v529_v19  ;;  %s1110_s20 = sshll.u32 %s1212_s12, 4  ;;  %s1111_s20 = int_to_ptr.vmem [resolvable:$false] %s1110_s20 }
 0x191   : > { %p1108_p1 = pnand %p1107_p8, %p1406_p10  ;;  %s1112_s29 = scalar_lea.vmem %s1111_s20, 128 }
 0x192   : > { %p1113_p11 = scmp.lt.s32.totalorder %s1571_s15, %s1111_s20  ;;  %p1114_p13 = scmp.lt.s32.totalorder %s1112_s29, %s1106_s8 }
 0x193   : > { %p1109_p12 = pneg %p1108_p1 }
 0x194   : > { %p1115_p6 = por %p1114_p13, %p1113_p11 }
 0x196   : > { %p1116_p3 = pnand %p1115_p6, %p1109_p12 }
 0x198   : > { %1119 = shalt.err (!%p1116_p3)
}
 0x199   : > { %s1120_s17 = scalar_lea.hbm %s1568_s18, 64  ;;  %s1124_s9 = scalar_lea.hbm %s1629_s6, 128 }
 0x19a   : > { %p1121_p5 = scmp.ne.s32.totalorder %s1568_s18, %s1120_s17  ;;  %p1125_p0 = scmp.lt.u32.totalorder %s1568_s18, %s1629_s6 }
 0x19b   : > { %p1126_p2 = scmp.lt.u32.totalorder %s1124_s9, %s1120_s17  ;;  %p1128_p8 = scmp.lt.u32.totalorder %s1120_s17, %s1568_s18 }
 0x19c   : > { %p1122_p7 = pnand %p1121_p5, %p1406_p10 }
 0x19d   : > { %p1127_p4 = por %p1126_p2, %p1125_p0 }
 0x19e   : > { %p1123_p9 = pneg %p1122_p7 }
 0x19f   : > { %p1129_p1 = por %p1128_p8, %p1127_p4 }
 0x1a1   : > { %p1130_p12 = pnand %p1129_p1, %p1123_p9 }
 0x1a3   : > { %1133 = shalt.err (!%p1130_p12)
}
 0x1a4   : > { %839 = dma.vmem_to_hbm [thread:$0]  (%p1406_p10), %s1571_s15, 64, %s1568_s18, %s1540_s7  }
 0x1a5 PF: > { %s1653_s30 = sld [smem:[#allocation19_spill]]  ;;  %s1654_s21 = sld [smem:[#allocation20_spill]] }
 0x1a6   : > { %p1656_p13 = scmp.ge.s32.totalorder %s1200_s26, 2 }
 0x1ab   : > { %s596_s24 = sand.u32 1, %s1653_s30   ;;  %p1655_p11 = scmp.ne.s32.totalorder %s1654_s21, 0 }
 0x1ac   : > { %s597_s11 = scalar_lea.sflag [#allocation4], %s596_s24 }
 0x1ad   : > { %p858_p6 = pnand %p1656_p13, %p1655_p11 }
 0x1af   : > { %1171 = dma.done.wait (!%p858_p6), %s597_s11, 64  }
 0x1b0   : > { %1173 = vsyncadd (!%p858_p6), %s597_s11, 4294967232  ;;  %s1657_s8 = sadd.s32 4294967294, %s1200_s26  }
 0x1b1   : > { %s605_s12 = sand.u32 1, %s1657_s8  }
 0x1b2   : > { %s606_s20 = scalar_lea.sflag [#allocation12], %s605_s12 }
 0x1b3   : > { %1175 = dma.done.wait (!%p858_p6), %s606_s20, 128  }
 0x1b4   : > { %1177 = vsyncadd (!%p858_p6), %s606_s20, 4294967168  ;;  %s28_s26 = sadd.s32 1, %s1200_s26   ;;  %s1658_s21 = smov %s1184_s22 }
 0x1b5   : > { %p25_p10 = scmp.ge.s32.totalorder %s28_s26, 4   ;;  %s1659_s22 = smov %s1188_s23 }
 0x1b6   : > { %s1660_s23 = smov %s1418_s16  ;;  %s1661_s24 = smov %s1196_s25 }
 0x1b7   : > { %s1662_s25 = smov %s1664_s10  ;;  %27 = sbr.rel (!%p25_p10) target bundleno = 10 (0xa), region = 125 }
 0x1be   :  { %620 = vsyncpa [#allocation3], 1 }
 0x1bf   :  { %622 = vsyncpa [#allocation3 + $0x1], 1 }
 0x1c0   :  { %623 = vsyncpa [#allocation6], 1 }
 0x1c1   :  { %624 = vsyncpa [#allocation9], 1 }
 0x1c2   :  { %625 = vsyncpa [#allocation4], 1 }
 0x1c3   :  { %627 = vsyncpa [#allocation4 + $0x1], 1 }
 0x1c4   :  { %628 = vsyncpa [#allocation12], 1 }
 0x1c5   :  { %630 = vsyncpa [#allocation12 + $0x1], 1 }

</bundles_post_ra>
